<compile_context>
chip_gen: v6e
topology: v6e:2x2x1
jax: 0.10.0
libtpu: 0.0.40
codegen_flags: <defaults>
</compile_context>

<pallas_src>
import functools

import jax
import jax.numpy as jnp
import numpy as np
from jax import lax
from jax.experimental import pallas as pl
from jax.experimental.pallas import tpu as pltpu


# ----------------------------------------------------------------------------
# Plain-JAX glue: SSD matching (jaccard / encode), equivalent to box_utils.match
# ----------------------------------------------------------------------------
def point_form(boxes):
    # (cx, cy, w, h) -> (xmin, ymin, xmax, ymax)
    return jnp.concatenate(
        [boxes[:, :2] - boxes[:, 2:] / 2.0, boxes[:, :2] + boxes[:, 2:] / 2.0],
        axis=1,
    )


def jaccard(box_a, box_b):
    # box_a: (T, 4) point form, box_b: (P, 4) point form -> (T, P) IoU
    max_xy = jnp.minimum(box_a[:, None, 2:], box_b[None, :, 2:])
    min_xy = jnp.maximum(box_a[:, None, :2], box_b[None, :, :2])
    inter_wh = jnp.clip(max_xy - min_xy, 0.0)
    inter = inter_wh[..., 0] * inter_wh[..., 1]
    area_a = ((box_a[:, 2] - box_a[:, 0]) * (box_a[:, 3] - box_a[:, 1]))[:, None]
    area_b = ((box_b[:, 2] - box_b[:, 0]) * (box_b[:, 3] - box_b[:, 1]))[None, :]
    return inter / (area_a + area_b - inter)


def encode(matched, priors, variances):
    # matched: (P, 4) point form GT, priors: (P, 4) center-size
    g_cxcy = (matched[:, :2] + matched[:, 2:]) / 2.0 - priors[:, :2]
    g_cxcy = g_cxcy / (variances[0] * priors[:, 2:])
    g_wh = (matched[:, 2:] - matched[:, :2]) / priors[:, 2:]
    g_wh = jnp.log(g_wh) / variances[1]
    return jnp.concatenate([g_cxcy, g_wh], axis=1)


def match_single(threshold, truths, priors, variances, labels):
    """Match one image's GT boxes to priors (SSD matching)."""
    overlaps = jaccard(truths, point_form(priors))           # (T, P)
    best_prior_idx = jnp.argmax(overlaps, axis=1)             # (T,)
    best_truth_overlap = jnp.max(overlaps, axis=0)            # (P,)
    best_truth_idx = jnp.argmax(overlaps, axis=0)             # (P,)
    # guarantee every GT keeps its best prior
    best_truth_overlap = best_truth_overlap.at[best_prior_idx].set(2.0)
    # replicate the sequential PyTorch loop exactly (small static T)
    for j in range(truths.shape[0]):
        best_truth_idx = best_truth_idx.at[best_prior_idx[j]].set(j)
    matches = truths[best_truth_idx]                          # (P, 4)
    conf = labels[best_truth_idx].astype(jnp.int32)           # (P,)
    conf = jnp.where(best_truth_overlap < threshold, 0, conf)
    loc = encode(matches, priors, variances)                  # (P, 4)
    return loc, conf


# ----------------------------------------------------------------------------
# Pallas kernel: per-tile (3, 128) partial sums of smooth-L1, CE, #pos
# ----------------------------------------------------------------------------
def _multibox_loss_kernel(loc_ref, conf_ref, label_ref, out_ref, *, num_priors):
    # loc_ref:   (1, 8, T, 128)  rows 0-3 = loc preds, rows 4-7 = encoded targets
    # conf_ref:  (1, C, T, 128)  class-major logits
    # label_ref: (1, T, 128)     matched labels (int32), 0 = background
    # out_ref:   (1, 1, 3, 128)  128-lane partial sums [smooth_l1, ce, #pos]
    t_rows = label_ref.shape[1]

    labels = label_ref[0]                                        # (T, 128) int32

    # prior validity mask (covers zero-padding to 128 and ragged last tile)
    row_ids = lax.broadcasted_iota(jnp.int32, (t_rows, 128), 0)
    lane_ids = lax.broadcasted_iota(jnp.int32, (t_rows, 128), 1)
    prior_ids = (pl.program_id(1) * t_rows + row_ids) * 128 + lane_ids
    pos = jnp.logical_and(labels > 0, prior_ids < num_priors)    # (T, 128) bool

    # ---- localization: smooth L1 over the 4 offsets (leading-axis reduce) ----
    loc_p = loc_ref[0, 0:4].astype(jnp.float32)                  # (4, T, 128)
    loc_t = loc_ref[0, 4:8].astype(jnp.float32)                  # (4, T, 128)
    d = loc_p - loc_t
    ad = jnp.abs(d)
    sl1 = jnp.where(ad < 1.0, 0.5 * d * d, ad - 0.5)
    loc_pp = jnp.sum(sl1, axis=0)                                # (T, 128)

    # ---- confidence: cross-entropy via logsumexp over the class (leading) axis
    conf = conf_ref[0].astype(jnp.float32)                       # (C, T, 128)
    m = jnp.max(conf, axis=0)                                    # (T, 128)
    s = jnp.sum(jnp.exp(conf - m[None]), axis=0)                 # (T, 128)
    cls_ids = lax.broadcasted_iota(jnp.int32, conf.shape, 0)     # (C, T, 128)
    tgt = jnp.sum(jnp.where(cls_ids == labels[None], conf, 0.0), axis=0)
    ce_pp = jnp.log(s) + m - tgt                                 # (T, 128)

    # ---- masked per-tile partials (where-select keeps padded garbage inert) ----
    loc_m = jnp.where(pos, loc_pp, 0.0)
    ce_m = jnp.where(pos, ce_pp, 0.0)
    pos_f = jnp.where(pos, 1.0, 0.0)

    out_ref[0, 0, 0:1, :] = jnp.sum(loc_m, axis=0, keepdims=True)
    out_ref[0, 0, 1:2, :] = jnp.sum(ce_m, axis=0, keepdims=True)
    out_ref[0, 0, 2:3, :] = jnp.sum(pos_f, axis=0, keepdims=True)


def _choose_rows_per_tile(np_rows, num_classes, batch):
    """Rows of 128 priors per tile, VMEM-budgeted and megacore-friendly."""
    # per 128-prior row, per buffered copy: conf (C) + packed loc (8) + labels (1), 4B each
    bytes_per_row = (num_classes + 8 + 1) * 128 * 4
    budget = 12 * 1024 * 1024          # headroom under the 32 MiB scoped VMEM limit (v7x-safe)
    cap = max(8, min(128, (budget // (2 * bytes_per_row)) // 8 * 8))
    if np_rows <= cap:
        if batch == 1 and np_rows >= 16:
            # keep >= 2 grid steps so both v7x TensorCores get work
            half = (((np_rows + 1) // 2) + 7) // 8 * 8
            return min(half, np_rows)
        return np_rows
    return cap


def multibox_loss_pallas(loc_data, conf_data, loc_t, conf_t):
    """loc_data (B,P,4), conf_data (B,P,C), loc_t (B,P,4), conf_t (B,P) int."""
    B, P, _ = loc_data.shape
    C = conf_data.shape[-1]

    np_rows = pl.cdiv(P, 128)          # prior rows of 128 lanes
    p_pad = np_rows * 128
    pad = p_pad - P

    # prior-major (lane-dense) layout; loc preds + encoded targets packed in one slab
    loc_pack = jnp.concatenate(
        [jnp.transpose(loc_data, (0, 2, 1)).astype(jnp.float32),
         jnp.transpose(loc_t, (0, 2, 1)).astype(jnp.float32)], axis=1)   # (B, 8, P)
    conf_pm = jnp.transpose(conf_data, (0, 2, 1))                        # (B, C, P)
    labels = conf_t.astype(jnp.int32)                                    # (B, P)
    if pad:
        # pad only to a multiple of 128 (fuses with the transpose copy);
        # padded priors get label 0 and are masked in-kernel anyway
        loc_pack = jnp.pad(loc_pack, ((0, 0), (0, 0), (0, pad)))
        conf_pm = jnp.pad(conf_pm, ((0, 0), (0, 0), (0, pad)))
        labels = jnp.pad(labels, ((0, 0), (0, pad)))
    # trailing-split reshapes are free (no data movement)
    loc_pack = loc_pack.reshape(B, 8, np_rows, 128)
    conf_pm = conf_pm.reshape(B, C, np_rows, 128)
    labels = labels.reshape(B, np_rows, 128)

    t_rows = _choose_rows_per_tile(np_rows, C, B)
    n_tiles = pl.cdiv(np_rows, t_rows)

    kernel = functools.partial(_multibox_loss_kernel, num_priors=P)
    cost = pl.CostEstimate(
        flops=B * p_pad * (3 * C + 24),
        transcendentals=B * p_pad * (C + 1),
        bytes_accessed=B * p_pad * (C + 8 + 1) * 4 + B * n_tiles * 3 * 128 * 4,
    )

    partials = pl.pallas_call(
        kernel,
        out_shape=jax.ShapeDtypeStruct((B, n_tiles, 3, 128), jnp.float32),
        grid_spec=pltpu.PrefetchScalarGridSpec(
            num_scalar_prefetch=0,
            grid=(B, n_tiles),
            in_specs=[
                pl.BlockSpec((1, 8, t_rows, 128), lambda b, p: (b, 0, p, 0)),
                pl.BlockSpec((1, C, t_rows, 128), lambda b, p: (b, 0, p, 0)),
                pl.BlockSpec((1, t_rows, 128), lambda b, p: (b, p, 0)),
            ],
            out_specs=pl.BlockSpec((1, 1, 3, 128), lambda b, p: (b, p, 0, 0)),
        ),
        compiler_params=pltpu.CompilerParams(
            dimension_semantics=("parallel", "parallel"),
            vmem_limit_bytes=32 * 1024 * 1024),
        cost_estimate=cost,
    )(loc_pack, conf_pm, labels)

    sums = jnp.sum(partials, axis=(0, 1, 3))      # (3,) = [sum_sl1, sum_ce, n_pos]
    n = jnp.maximum(sums[2], 1.0)
    return sums[0] / n, sums[1] / n


# ----------------------------------------------------------------------------
# Full module forward
# ----------------------------------------------------------------------------
class MultiBoxLossPallas:
    def __init__(self, num_classes, overlap_thresh, prior_for_matching,
                 bkg_label, neg_mining, neg_pos, neg_overlap, encode_target):
        self.num_classes = num_classes
        self.threshold = overlap_thresh
        self.background_label = bkg_label
        self.encode_target = encode_target
        self.use_prior_for_matching = prior_for_matching
        self.do_neg_mining = neg_mining
        self.negpos_ratio = neg_pos
        self.neg_overlap = neg_overlap
        self.variance = [0.1, 0.2]

    def match(self, priors, targets):
        def one(truths, labels):
            return match_single(self.threshold, truths, priors,
                                self.variance, labels)
        # batched matching (single fused HLO instead of B unrolled copies)
        return jax.vmap(one)(targets[:, :, :4], targets[:, :, -1])

    def forward(self, predictions, priors, targets):
        loc_data, conf_data = predictions
        loc_t, conf_t = self.match(priors, targets)    # (B,P,4), (B,P)
        return multibox_loss_pallas(loc_data, conf_data, loc_t, conf_t)


# ----------------------------------------------------------------------------
# Pure-JAX reference for the loss reduction (sanity check)
# ----------------------------------------------------------------------------
def _reference_loss(loc_data, conf_data, loc_t, conf_t):
    pos = conf_t > 0
    d = loc_data - loc_t
    ad = jnp.abs(d)
    sl1 = jnp.where(ad < 1.0, 0.5 * d * d, ad - 0.5)
    loss_l = jnp.sum(sl1 * pos[..., None])
    lse = jax.scipy.special.logsumexp(conf_data, axis=-1)
    tgt = jnp.take_along_axis(conf_data, conf_t[..., None], axis=-1)[..., 0]
    loss_c = jnp.sum((lse - tgt) * pos)
    n = jnp.maximum(jnp.sum(pos).astype(jnp.float32), 1.0)
    return loss_l / n, loss_c / n


# ----------------------------------------------------------------------------
# Demo
# ----------------------------------------------------------------------------
if __name__ == "__main__":
    key = jax.random.PRNGKey(0)
    B, T_gt, C = 2, 3, 4            # batch, GT objects per image, classes
    grid_n = 10                     # 10x10 prior grid x 2 scales -> P=200 (not a multiple of 128)

    k1, k2, k3, k4, k5 = jax.random.split(key, 5)

    # priors: grid of centers x 2 scales, center-size form, in [0, 1]
    g = (jnp.arange(grid_n, dtype=jnp.float32) + 0.5) / grid_n
    cx, cy = jnp.meshgrid(g, g, indexing="ij")
    centers = jnp.stack([cx.ravel(), cy.ravel()], axis=-1)          # (100, 2)
    sizes = jnp.array([[0.15, 0.15], [0.30, 0.30]], dtype=jnp.float32)
    priors = jnp.concatenate(
        [jnp.concatenate([centers, jnp.tile(s[None, :], (grid_n * grid_n, 1))], axis=1)
         for s in sizes], axis=0)                                   # (200, 4)
    P = priors.shape[0]

    # deterministic predictions
    loc_data = 0.5 * jax.random.normal(k1, (B, P, 4), dtype=jnp.float32)
    conf_data = jax.random.normal(k2, (B, P, C), dtype=jnp.float32)

    # ground truth: point-form boxes + label, label in [1, C-1]
    ctr = 0.2 + 0.6 * jax.random.uniform(k3, (B, T_gt, 2))
    wh = 0.10 + 0.20 * jax.random.uniform(k4, (B, T_gt, 2))
    boxes = jnp.concatenate([ctr - wh / 2.0, ctr + wh / 2.0], axis=-1)
    labels = jax.random.randint(k5, (B, T_gt, 1), 1, C).astype(jnp.float32)
    targets = jnp.concatenate([boxes, labels], axis=-1)             # (B, T_gt, 5)

    criterion = MultiBoxLossPallas(
        num_classes=C, overlap_thresh=0.35, prior_for_matching=True,
        bkg_label=0, neg_mining=True, neg_pos=7, neg_overlap=0.35,
        encode_target=False)

    loss_l, loss_c = criterion.forward((loc_data, conf_data), priors, targets)
    loss_l, loss_c = jax.block_until_ready((loss_l, loss_c))

    # sanity check against pure-JAX reference of the reduction
    loc_t_ref, conf_t_ref = criterion.match(priors, targets)
    ref_l, ref_c = _reference_loss(loc_data, conf_data, loc_t_ref, conf_t_ref)
    np.testing.assert_allclose(np.asarray(loss_l), np.asarray(ref_l),
                               rtol=1e-4, atol=1e-5)
    np.testing.assert_allclose(np.asarray(loss_c), np.asarray(ref_c),
                               rtol=1e-4, atol=1e-5)

    print("KERNEL_OK")
</pallas_src>

<mosaic_0001>
module attributes {stable_mosaic.version = 11 : i64} {
  func.func @_multibox_loss_kernel(%arg0: i32, %arg1: i32, %arg2: memref<1x8x2x128xf32, #tpu.memory_space<vmem>>, %arg3: memref<1x4x2x128xf32, #tpu.memory_space<vmem>>, %arg4: memref<1x2x128xi32, #tpu.memory_space<vmem>>, %arg5: memref<1x1x3x128xf32, #tpu.memory_space<vmem>>) attributes {dimension_semantics = [#tpu.dimension_semantics<parallel>, #tpu.dimension_semantics<parallel>], iteration_bounds = array<i64: 2, 1>, scalar_prefetch = 0 : i64, scratch_operands = 0 : i64, tpu.core_type = #tpu.core_type<tc>, window_params = [{transform_indices = @transform_0, window_bounds = array<i64: 1, 8, 2, 128>}, {transform_indices = @transform_1, window_bounds = array<i64: 1, 4, 2, 128>}, {transform_indices = @transform_2, window_bounds = array<i64: 1, 2, 128>}, {transform_indices = @transform_3, window_bounds = array<i64: 1, 1, 3, 128>}]} {
    %c0 = arith.constant 0 : index
    %c0_0 = arith.constant 0 : index
    %c0_1 = arith.constant 0 : index
    %0 = vector.load %arg4[%c0, %c0_0, %c0_1] : memref<1x2x128xi32, #tpu.memory_space<vmem>>, vector<1x2x128xi32>
    %1 = vector.shape_cast %0 : vector<1x2x128xi32> to vector<2x128xi32>
    %2 = tpu.iota {dimensions = array<i32: 0>} : vector<2x128xi32>
    %3 = tpu.iota {dimensions = array<i32: 1>} : vector<2x128xi32>
    %c2_i32 = arith.constant 2 : i32
    %4 = arith.muli %arg1, %c2_i32 : i32
    %5 = vector.broadcast %4 : i32 to vector<2x128xi32>
    %6 = arith.addi %5, %2 : vector<2x128xi32>
    %c128_i32 = arith.constant 128 : i32
    %7 = vector.broadcast %c128_i32 : i32 to vector<2x128xi32>
    %8 = arith.muli %6, %7 : vector<2x128xi32>
    %9 = arith.addi %8, %3 : vector<2x128xi32>
    %c0_i32 = arith.constant 0 : i32
    %10 = vector.broadcast %c0_i32 : i32 to vector<2x128xi32>
    %11 = arith.cmpi sgt, %1, %10 : vector<2x128xi32>
    %c200_i32 = arith.constant 200 : i32
    %12 = vector.broadcast %c200_i32 : i32 to vector<2x128xi32>
    %13 = arith.cmpi slt, %9, %12 : vector<2x128xi32>
    %14 = arith.andi %11, %13 : vector<2x128xi1>
    %c0_2 = arith.constant 0 : index
    %c0_3 = arith.constant 0 : index
    %c0_4 = arith.constant 0 : index
    %c0_5 = arith.constant 0 : index
    %15 = vector.load %arg2[%c0_2, %c0_3, %c0_4, %c0_5] : memref<1x8x2x128xf32, #tpu.memory_space<vmem>>, vector<1x4x2x128xf32>
    %16 = vector.shape_cast %15 : vector<1x4x2x128xf32> to vector<4x2x128xf32>
    %c0_6 = arith.constant 0 : index
    %c4 = arith.constant 4 : index
    %c0_7 = arith.constant 0 : index
    %c0_8 = arith.constant 0 : index
    %17 = vector.load %arg2[%c0_6, %c4, %c0_7, %c0_8] : memref<1x8x2x128xf32, #tpu.memory_space<vmem>>, vector<1x4x2x128xf32>
    %18 = vector.shape_cast %17 : vector<1x4x2x128xf32> to vector<4x2x128xf32>
    %19 = arith.subf %16, %18 : vector<4x2x128xf32>
    %20 = math.absf %19 : vector<4x2x128xf32>
    %cst = arith.constant 1.000000e+00 : f32
    %21 = vector.broadcast %cst : f32 to vector<4x2x128xf32>
    %22 = arith.cmpf olt, %20, %21 : vector<4x2x128xf32>
    %cst_9 = arith.constant 5.000000e-01 : f32
    %23 = vector.broadcast %cst_9 : f32 to vector<4x2x128xf32>
    %24 = arith.mulf %23, %19 : vector<4x2x128xf32>
    %25 = arith.mulf %24, %19 : vector<4x2x128xf32>
    %cst_10 = arith.constant 5.000000e-01 : f32
    %26 = vector.broadcast %cst_10 : f32 to vector<4x2x128xf32>
    %27 = arith.subf %20, %26 : vector<4x2x128xf32>
    %28 = arith.select %22, %25, %27 : vector<4x2x128xi1>, vector<4x2x128xf32>
    %cst_11 = arith.constant dense<0.000000e+00> : vector<2x128xf32>
    %29 = vector.multi_reduction <add>, %28, %cst_11 [0] : vector<4x2x128xf32> to vector<2x128xf32>
    %c0_12 = arith.constant 0 : index
    %c0_13 = arith.constant 0 : index
    %c0_14 = arith.constant 0 : index
    %c0_15 = arith.constant 0 : index
    %30 = vector.load %arg3[%c0_12, %c0_13, %c0_14, %c0_15] : memref<1x4x2x128xf32, #tpu.memory_space<vmem>>, vector<1x4x2x128xf32>
    %31 = vector.shape_cast %30 : vector<1x4x2x128xf32> to vector<4x2x128xf32>
    %cst_16 = arith.constant dense<0xFF800000> : vector<2x128xf32>
    %32 = vector.multi_reduction <maximumf>, %31, %cst_16 [0] : vector<4x2x128xf32> to vector<2x128xf32>
    %33 = vector.shape_cast %32 : vector<2x128xf32> to vector<1x2x128xf32>
    %34 = vector.broadcast %33 : vector<1x2x128xf32> to vector<4x2x128xf32>
    %35 = arith.subf %31, %34 : vector<4x2x128xf32>
    %36 = math.exp %35 : vector<4x2x128xf32>
    %cst_17 = arith.constant dense<0.000000e+00> : vector<2x128xf32>
    %37 = vector.multi_reduction <add>, %36, %cst_17 [0] : vector<4x2x128xf32> to vector<2x128xf32>
    %38 = tpu.iota {dimensions = array<i32: 0>} : vector<4x2x128xi32>
    %39 = vector.shape_cast %1 : vector<2x128xi32> to vector<1x2x128xi32>
    %40 = vector.broadcast %39 : vector<1x2x128xi32> to vector<4x2x128xi32>
    %41 = arith.cmpi eq, %38, %40 : vector<4x2x128xi32>
    %cst_18 = arith.constant 0.000000e+00 : f32
    %42 = vector.broadcast %cst_18 : f32 to vector<4x2x128xf32>
    %43 = arith.select %41, %31, %42 : vector<4x2x128xi1>, vector<4x2x128xf32>
    %cst_19 = arith.constant dense<0.000000e+00> : vector<2x128xf32>
    %44 = vector.multi_reduction <add>, %43, %cst_19 [0] : vector<4x2x128xf32> to vector<2x128xf32>
    %45 = math.log %37 : vector<2x128xf32>
    %46 = arith.addf %45, %32 : vector<2x128xf32>
    %47 = arith.subf %46, %44 : vector<2x128xf32>
    %cst_20 = arith.constant 0.000000e+00 : f32
    %48 = vector.broadcast %cst_20 : f32 to vector<2x128xf32>
    %49 = arith.select %14, %29, %48 : vector<2x128xi1>, vector<2x128xf32>
    %cst_21 = arith.constant 0.000000e+00 : f32
    %50 = vector.broadcast %cst_21 : f32 to vector<2x128xf32>
    %51 = arith.select %14, %47, %50 : vector<2x128xi1>, vector<2x128xf32>
    %cst_22 = arith.constant 1.000000e+00 : f32
    %cst_23 = arith.constant 0.000000e+00 : f32
    %52 = vector.broadcast %cst_22 : f32 to vector<2x128xf32>
    %53 = vector.broadcast %cst_23 : f32 to vector<2x128xf32>
    %54 = arith.select %14, %52, %53 : vector<2x128xi1>, vector<2x128xf32>
    %cst_24 = arith.constant dense<0.000000e+00> : vector<128xf32>
    %55 = vector.multi_reduction <add>, %49, %cst_24 [0] : vector<2x128xf32> to vector<128xf32>
    %56 = vector.shape_cast %55 : vector<128xf32> to vector<1x128xf32>
    %c0_25 = arith.constant 0 : index
    %c0_26 = arith.constant 0 : index
    %c0_27 = arith.constant 0 : index
    %c0_28 = arith.constant 0 : index
    %57 = vector.load %arg5[%c0_25, %c0_26, %c0_27, %c0_28] : memref<1x1x3x128xf32, #tpu.memory_space<vmem>>, vector<1x1x1x128xf32>
    %58 = vector.shape_cast %57 : vector<1x1x1x128xf32> to vector<1x128xf32>
    %59 = vector.shape_cast %56 : vector<1x128xf32> to vector<1x1x1x128xf32>
    tpu.vector_store %arg5[%c0_25, %c0_26, %c0_27, %c0_28], %59 {strides = array<i32>} : memref<1x1x3x128xf32, #tpu.memory_space<vmem>>, vector<1x1x1x128xf32>,
    %cst_29 = arith.constant dense<0.000000e+00> : vector<128xf32>
    %60 = vector.multi_reduction <add>, %51, %cst_29 [0] : vector<2x128xf32> to vector<128xf32>
    %61 = vector.shape_cast %60 : vector<128xf32> to vector<1x128xf32>
    %c0_30 = arith.constant 0 : index
    %c0_31 = arith.constant 0 : index
    %c1 = arith.constant 1 : index
    %c0_32 = arith.constant 0 : index
    %62 = vector.load %arg5[%c0_30, %c0_31, %c1, %c0_32] : memref<1x1x3x128xf32, #tpu.memory_space<vmem>>, vector<1x1x1x128xf32>
    %63 = vector.shape_cast %62 : vector<1x1x1x128xf32> to vector<1x128xf32>
    %64 = vector.shape_cast %61 : vector<1x128xf32> to vector<1x1x1x128xf32>
    tpu.vector_store %arg5[%c0_30, %c0_31, %c1, %c0_32], %64 {strides = array<i32>} : memref<1x1x3x128xf32, #tpu.memory_space<vmem>>, vector<1x1x1x128xf32>,
    %cst_33 = arith.constant dense<0.000000e+00> : vector<128xf32>
    %65 = vector.multi_reduction <add>, %54, %cst_33 [0] : vector<2x128xf32> to vector<128xf32>
    %66 = vector.shape_cast %65 : vector<128xf32> to vector<1x128xf32>
    %c0_34 = arith.constant 0 : index
    %c0_35 = arith.constant 0 : index
    %c2 = arith.constant 2 : index
    %c0_36 = arith.constant 0 : index
    %67 = vector.load %arg5[%c0_34, %c0_35, %c2, %c0_36] : memref<1x1x3x128xf32, #tpu.memory_space<vmem>>, vector<1x1x1x128xf32>
    %68 = vector.shape_cast %67 : vector<1x1x1x128xf32> to vector<1x128xf32>
    %69 = vector.shape_cast %66 : vector<1x128xf32> to vector<1x1x1x128xf32>
    tpu.vector_store %arg5[%c0_34, %c0_35, %c2, %c0_36], %69 {strides = array<i32>} : memref<1x1x3x128xf32, #tpu.memory_space<vmem>>, vector<1x1x1x128xf32>,
    return
  }
  func.func @transform_0(%arg0: i32, %arg1: i32) -> (i32, i32, i32, i32) {
    %c0_i32 = arith.constant 0 : i32
    %c0_i32_0 = arith.constant 0 : i32
    %c0_i32_1 = arith.constant 0 : i32
    return %arg0, %c0_i32, %arg1, %c0_i32_0 : i32, i32, i32, i32
  }
  func.func @transform_1(%arg0: i32, %arg1: i32) -> (i32, i32, i32, i32) {
    %c0_i32 = arith.constant 0 : i32
    %c0_i32_0 = arith.constant 0 : i32
    %c0_i32_1 = arith.constant 0 : i32
    return %arg0, %c0_i32, %arg1, %c0_i32_0 : i32, i32, i32, i32
  }
  func.func @transform_2(%arg0: i32, %arg1: i32) -> (i32, i32, i32) {
    %c0_i32 = arith.constant 0 : i32
    %c0_i32_0 = arith.constant 0 : i32
    return %arg0, %arg1, %c0_i32 : i32, i32, i32
  }
  func.func @transform_3(%arg0: i32, %arg1: i32) -> (i32, i32, i32, i32) {
    %c0_i32 = arith.constant 0 : i32
    %c0_i32_0 = arith.constant 0 : i32
    %c0_i32_1 = arith.constant 0 : i32
    return %arg0, %arg1, %c0_i32, %c0_i32_0 : i32, i32, i32, i32
  }
}

</mosaic_0001>

<bundles_post_ra>
// kernel: tpu_custom_call.1
= control target key start
LH: loop header
LB: loop body
LE: loop exit
PB: predicated region body
PF: predicated region fallthrough
CT: control target
= control target key end

     0   :  { %8 = vsyncpa [#allocation3], 0  ;;  %s1077_s0 = inlined_call_operand.hbm [shape: f32[2,8,2,128], index: 0, kind: input, shape index: {}]   ;;  %s1078_s1 = inlined_call_operand.hbm [shape: f32[2,4,2,128], index: 1, kind: input, shape index: {}]   ;;  %s1079_s2 = inlined_call_operand.hbm [shape: s32[2,2,128], index: 2, kind: input, shape index: {}]   ;;  %s1080_s3 = inlined_call_operand.vmem [shape: f32[2,1,3,128], index: 3, kind: output, shape index: {}]  }
   0x1   :  { %10 = vsyncpa [#allocation3 + $0x1], 0 }
   0x2   :  { %11 = vsyncpa [#allocation5], 0 }
   0x3   :  { %13 = vsyncpa [#allocation5 + $0x1], 0  ;;  %s830_s12 = smov 0   ;;  %s832_s13 = smov 0  }
   0x4   :  { %s834_s14 = smov 0   ;;  %s836_s15 = smov 0  }
   0x5   :  { %s838_s16 = smov 0   ;;  %s840_s17 = smov 0  }
   0x6 LB: > { %s1081_s18 = sadd.s32 4294967295, %s802_s17   ;;  %s31_s19 = sadd.s32 1, %s798_s16  ;;  %s802_s17 = sphi %s840_s17, %s19_s17   ;;  %s798_s16 = sphi %s838_s16, %s1100_s16   ;;  %s794_s15 = sphi %s836_s15, %s1099_s15   ;;  %s790_s14 = sphi %s834_s14, %s1098_s14   ;;  %s786_s13 = sphi %s832_s13, %s1097_s13   ;;  %s782_s12 = sphi %s830_s12, %s1096_s12  }
   0x7   : > { %p33_p0 = scmp.ge.s32.totalorder %s31_s19, 2  ;;  %s40_s20 = sadd.s32 1, %s790_s14 }
   0x8   : > { %p47_p1 = scmp.ne.s32.totalorder %s790_s14, %s786_s13  ;;  %p48_p2 = scmp.eq.s32.totalorder %s802_s17, 0 }
   0x9   : > { %s1102_s19 = smov (%p33_p0, %s31_s19), 0  ;;  %p53_p4 = scmp.ne.s32.totalorder %s786_s13, %s782_s12 }
   0xa   : > { %p49_p3 = por %p48_p2, %p47_p1  ;;  %s35_s21 = ssub.s32 %s798_s16, %s1102_s19 }
   0xb   : > { %p54_p5 = scmp.eq.s32.totalorder %s1081_s18, 0  ;;  %p38_p6 = scmp.eq.s32.totalorder %s35_s21, 0 }
   0xc   : > { %p602_p8 = scmp.lt.s32.totalorder %s802_s17, 2  ;;  %s880_s24 = sand.u32 1, %s790_s14  }
   0xd   : > { %p871_p7 = por %p54_p5, %p53_p4  ;;  %s183_s26 = sand.u32 1, %s802_s17  }
   0xe   : > { %s877_s23 = scalar_select %p38_p6, %s790_s14, %s40_s20  }
   0xf   : > { %p882_p9 = pnand %p602_p8, %p49_p3  ;;  %s564_s27 = sshll.u32 %s880_s24, 3 }
  0x10   : > { %s585_s28 = sshll.u32 %s798_s16, 7  ;;  %s187_s5 = scalar_lea.vmem [#allocation4], %s564_s27 }
  0x11   : > { %s194_s4 = scalar_lea.hbm %s1078_s1, %s585_s28  ;;  %s195_s6 = sshll.u32 %s187_s5, 4  ;;  %s196_s6 = int_to_ptr.vmem [resolvable:$true] %s195_s6 }
  0x12   : > { %p569_p10 = scmp.ge.s32.totalorder %s802_s17, 1  ;;  %s893_s7 = scalar_lea.sflag [#allocation5], %s183_s26 }
  0x13   : > { %p666_p11 = pneg %p882_p9  ;;  %s677_s8 = scalar_lea.vmem %s196_s6, 128 }
  0x14   : > { %p678_p12 = scmp.ne.s32.totalorder %s196_s6, %s677_s8  ;;  %s804_s9 = smov [#allocation4]  }
  0x15   : > { %s682_s10 = sshll.u32 %s804_s9, 4  ;;  %s683_s10 = int_to_ptr.vmem [resolvable:$false] %s682_s10 }
  0x16   : > { %p680_p13 = pnand %p678_p12, %p666_p11  ;;  %s684_s11 = scalar_lea.vmem %s683_s10, 256 }
  0x17   : > { %p685_p1 = scmp.lt.s32.totalorder %s196_s6, %s683_s10  ;;  %p686_p2 = scmp.lt.s32.totalorder %s684_s11, %s677_s8 }
  0x18   : > { %p681_p0 = pneg %p680_p13 }
  0x19   : > { %p687_p3 = por %p686_p2, %p685_p1 }
  0x1b   : > { %p688_p4 = pnand %p687_p3, %p681_p0 }
  0x1d   : > { %691 = shalt.err (!%p688_p4)
}
  0x1e   : > { %s805_s12 = smov 32   ;;  %s806_s20 = smov 2  }
  0x1f   : > { %598 = dma.hbm_to_vmem [thread:$0]  (!%p882_p9), %s194_s4, 128, %s196_s6, %s893_s7, %s805_s12, %s805_s12, %s806_s20  }
  0x20   : > { %p222_p5 = scmp.lt.s32.totalorder %s802_s17, 3  ;;  %s561_s26 = sshll.u32 %s880_s24, 4 }
  0x21   : > { %s584_s27 = sshll.u32 %s798_s16, 8  ;;  %s165_s5 = scalar_lea.vmem [#allocation2], %s561_s26 }
  0x22   : > { %p909_p6 = pnand %p569_p10, %p222_p5  ;;  %s172_s30 = scalar_lea.hbm %s1077_s0, %s584_s27 }
  0x23   : > { %s173_s8 = sshll.u32 %s165_s5, 4  ;;  %s567_s9 = sshll.u32 %s880_s24, 1  ;;  %s174_s8 = int_to_ptr.vmem [resolvable:$true] %s173_s8 }
  0x24   : > { %s162_s10 = scalar_lea.sflag [#allocation3], %s880_s24  ;;  %s705_s11 = scalar_lea.vmem %s174_s8, 256 }
  0x25   : > { %p706_p8 = scmp.ne.s32.totalorder %s174_s8, %s705_s11  ;;  %s807_s4 = smov [#allocation2]  }
  0x26   : > { %s710_s6 = sshll.u32 %s807_s4, 4  ;;  %s711_s6 = int_to_ptr.vmem [resolvable:$false] %s710_s6 }
  0x27   : > { %p708_p12 = pnand %p706_p8, %p666_p11  ;;  %s712_s18 = scalar_lea.vmem %s711_s6, 512 }
  0x28   : > { %p713_p13 = scmp.lt.s32.totalorder %s174_s8, %s711_s6  ;;  %p714_p0 = scmp.lt.s32.totalorder %s712_s18, %s705_s11 }
  0x29   : > { %p709_p10 = pneg %p708_p12 }
  0x2a   : > { %p715_p1 = por %p714_p0, %p713_p13 }
  0x2c   : > { %p716_p2 = pnand %p715_p1, %p709_p10 }
  0x2e   : > { %719 = shalt.err (!%p716_p2)
}
  0x2f   : > { %595 = dma.hbm_to_vmem [thread:$0]  (!%p882_p9), %s172_s30, 256, %s174_s8, %s162_s10, %s805_s12, %s805_s12, %s806_s20  }
  0x30   : > { %s568_s24 = sshll.u32 %s798_s16, 5  ;;  %s209_s29 = scalar_lea.vmem [#allocation6], %s567_s9 }
  0x31   : > { %s215_s28 = scalar_lea.hbm %s1079_s2, %s568_s24  ;;  %s217_s5 = sshll.u32 %s209_s29, 4  ;;  %s218_s5 = int_to_ptr.vmem [resolvable:$true] %s217_s5 }
  0x32   : > { %s733_s18 = scalar_lea.vmem %s218_s5, 32  ;;  %s808_s11 = smov [#allocation6]  }
  0x33   : > { %p734_p3 = scmp.ne.s32.totalorder %s218_s5, %s733_s18  ;;  %s738_s4 = sshll.u32 %s808_s11, 4  ;;  %s739_s4 = int_to_ptr.vmem [resolvable:$false] %s738_s4 }
  0x34   : > { %s740_s6 = scalar_lea.vmem %s739_s4, 64  ;;  %p741_p8 = scmp.lt.s32.totalorder %s218_s5, %s739_s4 }
  0x35   : > { %p736_p4 = pnand %p734_p3, %p666_p11  ;;  %p742_p12 = scmp.lt.s32.totalorder %s740_s6, %s733_s18 }
  0x37   : > { %p737_p5 = pneg %p736_p4  ;;  %p743_p10 = por %p742_p12, %p741_p8 }
  0x39   : > { %p744_p13 = pnand %p743_p10, %p737_p5 }
  0x3b   : > { %747 = shalt.err (!%p744_p13)
}
  0x3c   : > { %601 = dma.hbm_to_vmem [thread:$0]  (!%p882_p9), %s215_s28, 32, %s218_s5, %s893_s7  }
  0x3d   : > { %226 = sbr.rel (%p909_p6) target bundleno = 149 (0x95), region = 32  ;;  %s228_s12 = sand.u32 (!%p909_p6), 1, %s786_s13  }
  0x3e   : > { %s570_s20 = sshll.u32 (!%p909_p6), %s228_s12, 4  ;;  %s229_s30 = scalar_lea.sflag (!%p909_p6), [#allocation3], %s228_s12 }
  0x3f   : > { %s232_s8 = scalar_lea.vmem (!%p909_p6), [#allocation2], %s570_s20 }
  0x42   : > { %773 = dma.done.wait (%p871_p7), %s229_s30, 256  }
  0x43   : > { %775 = vsyncadd (%p871_p7), %s229_s30, 4294967040  ;;  %s1085_s9 = sadd.s32 4294967295, %s802_s17   ;;  %s571_s10 = sshll.u32 %s228_s12, 3 }
  0x44   : > { %s237_s25 = sand.u32 1, %s1085_s9   ;;  %s947_s24 = scalar_lea.vmem [#allocation4], %s571_s10 }
  0x45   : > { %s238_s7 = scalar_lea.sflag [#allocation5], %s237_s25 }
  0x46   : > { %777 = dma.done.wait (%p871_p7), %s238_s7, 160  }
  0x47   : > { %779 = vsyncadd (%p871_p7), %s238_s7, 4294967136  ;;  %v293_v0 = vlaneseq  ;;  %s572_s21 = sshll.u32 %s228_s12, 1  ;;  %v305_v5 = vld [vmem:[%s232_s8] sm:$0x3]  ;;  %v306_v6 = vld [vmem:[%s232_s8 + $0x2] sm:$0x3] }
  0x48   : > { %v307_v7 = vld [vmem:[%s232_s8 + $0x4] sm:$0x3]  ;;  %v308_v8 = vld [vmem:[%s232_s8 + $0x6] sm:$0x3]  ;;  %v574_v9 = vld [vmem:[%s232_s8 + $0x8] sm:$0x3] }
  0x49   : > { %v294_v1 = vshrl.u32 %v293_v0, 7  ;;  %v296_v2 = vand.u32 127, %v293_v0  ;;  %v575_v10 = vld [vmem:[%s232_s8 + $0xa] sm:$0x3]  ;;  %vm342_vm0 = vcmask 1041408   ;;  %s250_s26 = scalar_lea.vmem [#allocation6], %s572_s21  ;;  %v314_v14 = vsub.f32 %v305_v5, %v574_v9 }
  0x4a   : > { %v953_v11 = vld [vmem:[%s250_s26] sm:$0x3]  ;;  %v576_v12 = vld [vmem:[%s232_s8 + $0xc] sm:$0x3]  ;;  %v577_v13 = vld [vmem:[%s232_s8 + $0xe] sm:$0x3]  ;;  %v315_v15 = vsub.f32 %v306_v6, %v575_v10 }
  0x4b   : > { %v300_v3 = vmul.u32 128, %v294_v1  ;;  %vm302_vm1 = vcmp.gt.s32.totalorder %v953_v11, 0  ;;  %v316_v16 = vsub.f32 %v307_v7, %v576_v12  ;;  %v317_v17 = vsub.f32 %v308_v8, %v577_v13  ;;  %v957_v22 = vld [vmem:[%s947_s24] sm:$0x3]  ;;  %v960_v23 = vld [vmem:[%s947_s24 + $0x2] sm:$0x3] }
  0x4c   : > { %v318_v18 = vand.u32 2147483647, %v314_v14  ;;  %v319_v19 = vand.u32 2147483647, %v315_v15  ;;  %v326_v20 = vmul.f32 0.5, %v314_v14  ;;  %v327_v21 = vmul.f32 0.5, %v315_v15 }
  0x4d   : > { %v301_v4 = vadd.s32 %v300_v3, %v296_v2  ;;  %v320_v24 = vand.u32 2147483647, %v316_v16  ;;  %v321_v25 = vand.u32 2147483647, %v317_v17  ;;  %v328_v26 = vmul.f32 0.5, %v316_v16  ;;  %p285_p7 = scmp.lt.s32.totalorder %s794_s15, 1 }
  0x4e   : > { %v329_v27 = vmul.f32 0.5, %v317_v17  ;;  %vm962_vm3 = vcmp.lt.f32.partialorder %v318_v18, 1.0  ;;  %vm966_vm4 = vcmp.lt.f32.partialorder %v319_v19, 1.0  ;;  %v330_v30 = vmul.f32 %v326_v20, %v314_v14  ;;  %v971_v32 = vld [vmem:[%s947_s24 + $0x4] sm:$0x3] }
  0x4f   : > { %vm303_vm2 = vcmp.lt.s32.totalorder %v301_v4, 200  ;;  %v331_v31 = vmul.f32 %v327_v21, %v315_v15  ;;  %v974_v33 = vld [vmem:[%s947_s24 + $0x6] sm:$0x3]  ;;  %vm976_vm5 = vcmp.lt.f32.partialorder %v320_v24, 1.0  ;;  %vm980_vm6 = vcmp.lt.f32.partialorder %v321_v25, 1.0  ;;  %s1104_s15 = smov (!%p285_p7, %s794_s15), 1 }
  0x50   : > { %v332_v36 = vmul.f32 %v328_v26, %v316_v16  ;;  %v333_v37 = vmul.f32 %v329_v27, %v317_v17  ;;  %v578_v38 = vadd.f32 -0.5, %v318_v18  ;;  %v579_v39 = vadd.f32 -0.5, %v319_v19  ;;  %vm1006_vm7 = vmand %vm302_vm1, %vm303_vm2  ;;  %s573_s22 = sshll.u32 %s1104_s15, 2 }
  0x51   : > { %v580_v40 = vadd.f32 -0.5, %v320_v24  ;;  %v581_v41 = vadd.f32 -0.5, %v321_v25  ;;  %v354_v42 = vsel %vm342_vm0, %v957_v22, -inf  ;;  %v355_v43 = vsel %vm342_vm0, %v960_v23, -inf  ;;  %s1034_s29 = scalar_lea.vmem %s1080_s3, %s573_s22 }
  0x52   : > { %v356_v44 = vsel %vm342_vm0, %v971_v32, -inf  ;;  %v357_v45 = vsel %vm342_vm0, %v974_v33, -inf  ;;  %v338_v46 = vsel %vm962_vm3, %v330_v30, %v578_v38  ;;  %v339_v47 = vsel %vm966_vm4, %v331_v31, %v579_v39 }
  0x53   : > { %v340_v48 = vsel %vm976_vm5, %v332_v36, %v580_v40  ;;  %v341_v49 = vsel %vm980_vm6, %v333_v37, %v581_v41  ;;  %v343_v50 = vsel %vm342_vm0, %v338_v46, 0.0  ;;  %v344_v51 = vsel %vm342_vm0, %v339_v47, 0.0 }
  0x54   : > { %v346_v52 = vsel %vm342_vm0, %v340_v48, 0.0  ;;  %v345_v54 = vadd.f32 %v344_v51, %v343_v50  ;;  %v358_v55 = vmax.f32 %v354_v42, %v355_v43  ;;  %v359_v56 = vmax.f32 %v356_v44, %v357_v45 }
  0x55   : > { %v348_v57 = vsel %vm342_vm0, %v341_v49, 0.0  ;;  %v809_v60 = vmov 0.0   ;;  %vm380_vm8 = vcmp.eq.s32.totalorder %v953_v11, 0  ;;  %vm381_vm9 = vcmp.eq.s32.totalorder %v953_v11, 1 }
  0x56   : > { %v347_v58 = vadd.f32 %v346_v52, %v345_v54  ;;  %v1011_v59 = vmax.f32 %v358_v55, %v359_v56  ;;  %v401_v61 = vsel %vm1006_vm7, 1.0, %v809_v60  ;;  %v384_v38 = vsel %vm380_vm8, %v957_v22, 0.0 }
  0x57   : > { %v418_v3 = vsel %vm342_vm0, %v401_v61, 0.0  ;;  %v385_v39 = vsel %vm381_vm9, %v960_v23, 0.0  ;;  %vm382_vm10 = vcmp.eq.s32.totalorder %v953_v11, 2  ;;  %v388_v40 = vsel %vm342_vm0, %v384_v38, 0.0 }
  0x58   : > { %v349_v62 = vadd.f32 %v348_v57, %v347_v58  ;;  %v361_v63 = vsub.f32 %v957_v22, %v1011_v59  ;;  %v362_v0 = vsub.f32 %v960_v23, %v1011_v59  ;;  %v363_v1 = vsub.f32 %v971_v32, %v1011_v59 }
  0x59   : > { %v364_v2 = vsub.f32 %v974_v33, %v1011_v59  ;;  %v419_v7 = vrot.slane %v418_v3, 4  ;;  %v389_v41 = vsel %vm342_vm0, %v385_v39, 0.0  ;;  %v386_v42 = vsel %vm382_vm10, %v971_v32, 0.0 }
  0x5a   : > { %v399_v4 = vsel %vm1006_vm7, %v349_v62, 0.0  ;;  %v365_v5 = vmul.f32 1.442695, %v361_v63  ;;  %v367_v6 = vmul.f32 1.442695, %v362_v0  ;;  %vm383_vm11 = vcmp.eq.s32.totalorder %v953_v11, 3 }
  0x5b   : > { %v402_v8 = vsel %vm342_vm0, %v399_v4, 0.0  ;;  %v369_v9 = vmul.f32 1.442695, %v363_v1  ;;  %v371_v10 = vmul.f32 1.442695, %v364_v2  ;;  %v420_v13 = vadd.f32 %v419_v7, %v418_v3 }
  0x5c   : > { %v403_v12 = vrot.slane %v402_v8, 4  ;;  %654 = vpow2.f32 %v365_v5  ;;  %v390_v43 = vadd.f32 %v389_v41, %v388_v40  ;;  %v391_v44 = vsel %vm342_vm0, %v386_v42, 0.0 }
  0x5d   : > { %656 = vpow2.f32 %v367_v6  ;;  %v421_v15 = vrot.slane %v420_v13, 2  ;;  %v387_v45 = vsel %vm383_vm11, %v974_v33, 0.0 }
  0x5e   : > { %v404_v14 = vadd.f32 %v403_v12, %v402_v8  ;;  %658 = vpow2.f32 %v369_v9  ;;  %v392_v22 = vadd.f32 %v391_v44, %v390_v43  ;;  %v393_v23 = vsel %vm342_vm0, %v387_v45, 0.0 }
  0x5f   : > { %660 = vpow2.f32 %v371_v10  ;;  %v422_v17 = vadd.f32 %v421_v15, %v420_v13 }
  0x60   : > { %v405_v16 = vrot.slane %v404_v14, 2  ;;  %v394_v47 = vadd.f32 %v393_v23, %v392_v22 }
  0x61   : > { %v423_v19 = vrot.slane %v422_v17, 1 }
  0x62   : > { %v406_v18 = vadd.f32 %v405_v16, %v404_v14 }
  0x63   : > { %v424_v21 = vadd.f32 %v423_v19, %v422_v17 }
  0x64   : > { %v407_v20 = vrot.slane %v406_v18, 1 }
  0x65   : > { %425 = vst [vmem:[%s1034_s29 + $0x2] sm:$0x1] %v424_v21 }
  0x66   : > { %v408_v24 = vadd.f32 %v407_v20, %v406_v18 }
  0x68   : > { %409 = vst [vmem:[%s1034_s29] sm:$0x1] %v408_v24 }
  0x69   : > { %v655_v25 = vpop.eup %654 }
  0x6a   : > { %v657_v26 = vpop.eup %656  ;;  %v373_v27 = vsel %vm342_vm0, %v655_v25, 0.0 }
  0x6b   : > { %v659_v28 = vpop.eup %658  ;;  %v374_v29 = vsel %vm342_vm0, %v657_v26, 0.0 }
  0x6c   : > { %v661_v30 = vpop.eup %660  ;;  %v375_v31 = vadd.f32 %v374_v29, %v373_v27  ;;  %v376_v34 = vsel %vm342_vm0, %v659_v28, 0.0 }
  0x6d   : > { %v378_v35 = vsel %vm342_vm0, %v661_v30, 0.0 }
  0x6e   : > { %v377_v36 = vadd.f32 %v376_v34, %v375_v31 }
  0x70   : > { %v379_v37 = vadd.f32 %v378_v35, %v377_v36 }
  0x72   : > { %662 = vlog2.f32 %v379_v37 }
  0x7f   : > { %v663_v46 = vpop.eup %662 }
  0x80   : > { %v396_v48 = vmul.f32 0.6931472, %v663_v46 }
  0x82   : > { %v397_v49 = vadd.f32 %v396_v48, %v1011_v59 }
  0x84   : > { %v398_v50 = vsub.f32 %v397_v49, %v394_v47 }
  0x86   : > { %v400_v32 = vsel %vm1006_vm7, %v398_v50, 0.0 }
  0x87   : > { %v410_v11 = vsel %vm342_vm0, %v400_v32, 0.0 }
  0x88   : > { %v411_v51 = vrot.slane %v410_v11, 4 }
  0x8a   : > { %v412_v52 = vadd.f32 %v411_v51, %v410_v11 }
  0x8c   : > { %v413_v54 = vrot.slane %v412_v52, 2 }
  0x8e   : > { %v414_v55 = vadd.f32 %v413_v54, %v412_v52 }
  0x90   : > { %v415_v33 = vrot.slane %v414_v55, 1 }
  0x92   : > { %v416_v56 = vadd.f32 %v415_v33, %v414_v55 }
  0x94   : > { %417 = vst [vmem:[%s1034_s29 + $0x1] sm:$0x1] %v416_v56 }
  0x95 PF: > { %s19_s17 = sadd.s32 1, %s802_s17   ;;  %s1096_s12 = smov %s786_s13 }
  0x96   : > { %p16_p9 = scmp.ge.s32.totalorder %s19_s17, 4   ;;  %s1097_s13 = smov %s790_s14 }
  0x97   : > { %s1098_s14 = smov %s877_s23  ;;  %s1099_s15 = smov %s798_s16 }
  0x98   : > { %s1100_s16 = smov %s1102_s19  ;;  %18 = sbr.rel (!%p16_p9) target bundleno = 6 (0x6), region = 97 }
  0x9d   :  { %451 = vsyncpa [#allocation3], 1 }
  0x9e   :  { %453 = vsyncpa [#allocation3 + $0x1], 1 }
  0x9f   :  { %454 = vsyncpa [#allocation5], 1 }
  0xa0   :  { %456 = vsyncpa [#allocation5 + $0x1], 1 }

</bundles_post_ra>
